<compile_context>
chip_gen: v6e
topology: v6e:2x2x1
jax: 0.10.0
libtpu: 0.0.40
codegen_flags: <defaults>
</compile_context>

<pallas_src>
import functools

import jax
import jax.numpy as jnp
from jax import lax
from jax.experimental import pallas as pl
from jax.experimental.pallas import tpu as pltpu


def _round_up(v, m):
    return ((v + m - 1) // m) * m


def _vmem_capacity():
    try:
        return int(pltpu.get_tpu_info().vmem_capacity_bytes)
    except Exception:
        return 64 << 20          # conservative fallback (v7x per-core VMEM)


def _vmem_limit_bytes():
    return min(int(_vmem_capacity() * 0.9), 120 << 20)


def _pick_row_tile(n, f_in, ppad, nhead):
    """Largest destination-row tile whose working set fits the VMEM budget.

    Candidates are multiples of 128 so every BlockSpec minor dim is either a
    multiple of the hardware register tiling or a full array extent; if no
    candidate divides N, fall back to a single full-size tile.
    """
    budget = int(0.6 * _vmem_capacity())
    # Grid-invariant resident operands (x2 for potential double-buffering).
    resident = 2 * (n * f_in * 4 + n * ppad * 2 + nhead * n * 4)
    for t in (512, 256, 128):
        if n % t:
            continue
        tiles = 2 * (t * max(f_in, 128) * 4       # x destination tile
                     + 2 * t * n                  # adj in + newadj out (int8)
                     + t * ppad * 4)              # output tile
        working = 6 * t * n * 4                   # sim / e / p / struct temps
        if resident + tiles + working <= budget:
            return t
    # TODO(synk): for very large N add a source-column grid axis with an
    # online softmax (needed once hh no longer fits v7x's 64 MiB VMEM).
    return n


# ---------------------------------------------------------------------------
# Kernel 1 (per layer, per row tile): hoisted prep work.
#   xn_T : (F, N)   lane-dense row-normalized features (for the sim matmul)
#   hh   : (N, ppad) bf16 all-heads projection x @ w_pad
#   er_T : (nhead, N) per-source additive-attention term  <ar_h, hh_h>
# ---------------------------------------------------------------------------
def _prep_kernel(x_ref, w_ref, ar_ref, xnt_ref, hh_ref, ert_ref, *,
                 nhead, out_feats):
    xt = x_ref[...]                                          # (tm, f_in) f32
    sq = jnp.sum(xt * xt, axis=1, keepdims=True)
    xn = xt * jnp.where(sq > 0.0, lax.rsqrt(sq), 0.0)
    xnt_ref[...] = xn.T                                      # (f_in, tm)

    # bf16 MXU feed with f32 accumulation (does not feed the 0.1 threshold).
    hh = jnp.dot(xt.astype(jnp.bfloat16), w_ref[...].astype(jnp.bfloat16),
                 preferred_element_type=jnp.float32)         # (tm, ppad)
    hh_ref[...] = hh.astype(jnp.bfloat16)

    ar = ar_ref[...]                                         # (nhead, f_out)
    for h in range(nhead):                                   # static, small
        c0 = h * out_feats
        erh = lax.dot_general(ar[h:h + 1, :], hh[:, c0:c0 + out_feats],
                              (((1,), (1,)), ((), ())),
                              preferred_element_type=jnp.float32)   # (1, tm)
        ert_ref[h:h + 1, :] = erh


def prep_layer(x, w_pad, ar, *, nhead, out_feats, tm):
    n, f_in = x.shape
    ppad = w_pad.shape[1]
    kernel = functools.partial(_prep_kernel, nhead=nhead, out_feats=out_feats)
    return pl.pallas_call(
        kernel,
        out_shape=(jax.ShapeDtypeStruct((f_in, n), jnp.float32),
                   jax.ShapeDtypeStruct((n, ppad), jnp.bfloat16),
                   jax.ShapeDtypeStruct((nhead, n), jnp.float32)),
        grid=(n // tm,),
        in_specs=[pl.BlockSpec((tm, f_in), lambda i: (i, 0)),
                  pl.BlockSpec((f_in, ppad), lambda i: (0, 0)),
                  pl.BlockSpec((nhead, out_feats), lambda i: (0, 0))],
        out_specs=(pl.BlockSpec((f_in, tm), lambda i: (0, i)),
                   pl.BlockSpec((tm, ppad), lambda i: (i, 0)),
                   pl.BlockSpec((nhead, tm), lambda i: (0, i))),
        compiler_params=pltpu.CompilerParams(
            dimension_semantics=("parallel",),
            vmem_limit_bytes=_vmem_limit_bytes()),
    )(x, w_pad, ar)


# ---------------------------------------------------------------------------
# Kernel 2 (per layer, per row tile): fused GNNGuard att_coef structure +
# multi-head GAT attention over destination-row blocks.
# ---------------------------------------------------------------------------
def _guard_attn_kernel(x_ref, adj_ref, xnt_ref, hh_ref, al_ref, ert_ref,
                       out_ref, newadj_ref, *, nhead, out_feats, apply_act):
    tm, n = adj_ref.shape
    row0 = pl.multiple_of(pl.program_id(0) * tm, tm)

    # ---- att_coef structure: destination rows vs all sources ---------------
    x_d = x_ref[...]                                         # (tm, f_in) f32
    sq = jnp.sum(x_d * x_d, axis=1, keepdims=True)
    xn_d = x_d * jnp.where(sq > 0.0, lax.rsqrt(sq), 0.0)
    # f32 matmul on purpose: feeds the hard 0.1 edge threshold.
    sim = jnp.dot(xn_d, xnt_ref[...],
                  preferred_element_type=jnp.float32)        # (tm, n)

    edge = adj_ref[...] != 0
    rows = lax.broadcasted_iota(jnp.int32, (tm, n), 0) + row0
    cols = lax.broadcasted_iota(jnp.int32, (tm, n), 1)
    is_diag = rows == cols
    # With drop=False the reference's final nonzero pattern is always
    # (thresholded existing edges) U (full diagonal): the diag-removal branch
    # only alters edge values, and the 1/(deg+1) self-loop diagonal is always
    # re-inserted (att_dense_norm[0,0] is 0 in either branch).
    struct = jnp.logical_or(jnp.logical_and(edge, sim >= 0.1), is_diag)
    newadj_ref[...] = struct.astype(jnp.int8)                # 4x less HBM

    # ---- multi-head GAT attention over the new structure --------------------
    hh_all = hh_ref[...]                                     # (n, ppad) bf16
    hh_d = hh_ref[pl.ds(row0, tm), :]                        # (tm, ppad) bf16
    al = al_ref[...]                                         # (nhead, f_out)
    neg = jnp.float32(-1e30)
    width = nhead * out_feats
    ppad = out_ref.shape[1]

    for h in range(nhead):                                   # static, small
        c0 = h * out_feats
        hs = hh_all[:, c0:c0 + out_feats]                    # (n, f_out) bf16
        hd = hh_d[:, c0:c0 + out_feats].astype(jnp.float32)  # (tm, f_out)
        el = jnp.sum(hd * al[h:h + 1, :], axis=1, keepdims=True)     # (tm, 1)
        er = ert_ref[h:h + 1, :]                             # (1, n) hoisted
        e = el + er                                          # (tm, n)
        e = jnp.where(e > 0, e, 0.2 * e)                     # LeakyReLU(0.2)
        e = jnp.where(struct, e, neg)
        m = jnp.max(e, axis=1, keepdims=True)
        p = jnp.exp(e - m)                                   # masked -> 0
        # diagonal is always kept -> denom >= 1, no zero-guard needed
        alpha = p * pl.reciprocal(jnp.sum(p, axis=1, keepdims=True),
                                  approx=True)
        oh = jnp.dot(alpha.astype(jnp.bfloat16), hs,
                     preferred_element_type=jnp.float32)     # (tm, f_out)
        if apply_act:                                        # F.leaky_relu
            oh = jnp.where(oh > 0, oh, 0.01 * oh)
        out_ref[:, c0:c0 + out_feats] = oh                   # direct write

    if ppad > width:                                         # keep pads zero
        out_ref[:, width:] = jnp.zeros((tm, ppad - width), jnp.float32)


def gat_guard_layer(x, adj_i8, xn_t, hh, er_t, al, *, nhead, out_feats,
                    apply_act, tm):
    n, f_in = x.shape
    ppad = hh.shape[1]
    kernel = functools.partial(_guard_attn_kernel, nhead=nhead,
                               out_feats=out_feats, apply_act=apply_act)
    out, newadj = pl.pallas_call(
        kernel,
        out_shape=(jax.ShapeDtypeStruct((n, ppad), jnp.float32),
                   jax.ShapeDtypeStruct((n, n), jnp.int8)),
        grid=(n // tm,),
        in_specs=[
            pl.BlockSpec((tm, f_in), lambda i: (i, 0)),      # x dest tile
            pl.BlockSpec((tm, n), lambda i: (i, 0)),         # adj tile (int8)
            pl.BlockSpec((f_in, n), lambda i: (0, 0)),       # xn_T resident
            pl.BlockSpec((n, ppad), lambda i: (0, 0)),       # hh resident
            pl.BlockSpec((nhead, out_feats), lambda i: (0, 0)),
            pl.BlockSpec((nhead, n), lambda i: (0, 0)),      # er_T resident
        ],
        out_specs=(
            pl.BlockSpec((tm, ppad), lambda i: (i, 0)),      # x_out (padded)
            pl.BlockSpec((tm, n), lambda i: (i, 0)),         # new structure
        ),
        compiler_params=pltpu.CompilerParams(
            dimension_semantics=("parallel",),
            vmem_limit_bytes=_vmem_limit_bytes()),
    )(x, adj_i8, xn_t, hh, al, er_t)
    return out, newadj


# ---------------------------------------------------------------------------
# GATGuard model (deterministic synthetic parameters)
# ---------------------------------------------------------------------------
class GATGuardPallas:
    def __init__(self, in_feats, hidden_size, out_feats, num_layers,
                 num_heads, key):
        if isinstance(hidden_size, int):
            hidden_size = [hidden_size] * (num_layers - 1)
        n_features = [in_feats] + list(hidden_size) + [out_feats]
        # TODO(synk): optional LayerNorm / Dropout / drop_learn branches are
        # disabled by the module's default arguments and are not instantiated.
        self.layers = []
        in_width = in_feats                    # padded width of x entering
        for i in range(num_layers):
            layer_in = n_features[i] * num_heads if i != 0 else n_features[i]
            layer_out = n_features[i + 1]
            nhead = num_heads if i != num_layers - 1 else 1
            key, k1, k2, k3 = jax.random.split(key, 4)
            width = nhead * layer_out
            ppad = _round_up(width, 128)
            w = 0.1 * jax.random.normal(k1, (layer_in, width), jnp.float32)
            # Rows beyond layer_in correspond to the zero pad columns the
            # previous layer leaves in x (x stays padded between layers).
            w_pad = jnp.zeros((in_width, ppad), jnp.float32)
            w_pad = w_pad.at[:layer_in, :width].set(w)
            al = 0.1 * jax.random.normal(k2, (nhead, layer_out), jnp.float32)
            ar = 0.1 * jax.random.normal(k3, (nhead, layer_out), jnp.float32)
            self.layers.append(
                dict(w_pad=w_pad, al=al, ar=ar, nhead=nhead,
                     out_feats=layer_out, act=(i != num_layers - 1)))
            in_width = ppad
        self.final_width = self.layers[-1]["nhead"] * self.layers[-1]["out_feats"]

    def __call__(self, x, adj):
        adj_i8 = (adj != 0).astype(jnp.int8)   # structure-only consumption
        for lp in self.layers:
            n, f_in = x.shape
            ppad = lp["w_pad"].shape[1]
            tm = _pick_row_tile(n, f_in, ppad, lp["nhead"])
            xn_t, hh, er_t = prep_layer(
                x, lp["w_pad"], lp["ar"],
                nhead=lp["nhead"], out_feats=lp["out_feats"], tm=tm)
            x, adj_i8 = gat_guard_layer(
                x, adj_i8, xn_t, hh, er_t, lp["al"],
                nhead=lp["nhead"], out_feats=lp["out_feats"],
                apply_act=lp["act"], tm=tm)     # .flatten(1) built in
        return x[:, :self.final_width]          # single slice at model output


# ---------------------------------------------------------------------------
if __name__ == "__main__":
    N, IN_FEATS, HIDDEN, OUT_FEATS = 64, 16, 32, 8
    NUM_LAYERS, NUM_HEADS = 2, 2

    key = jax.random.PRNGKey(0)
    key, kx, ka, kp = jax.random.split(key, 4)

    x = jax.random.normal(kx, (N, IN_FEATS), jnp.float32)
    adj = (jax.random.uniform(ka, (N, N)) < 0.1).astype(jnp.float32)
    adj = jnp.maximum(adj, adj.T)                        # undirected
    adj = adj * (1.0 - jnp.eye(N, dtype=jnp.float32))    # no self loops

    model = GATGuardPallas(IN_FEATS, HIDDEN, OUT_FEATS, NUM_LAYERS,
                           NUM_HEADS, kp)
    out = model(x, adj)
    out = jax.block_until_ready(out)
    assert out.shape == (N, OUT_FEATS) and out.dtype == jnp.float32
    assert bool(jnp.all(jnp.isfinite(out)))
    print("KERNEL_OK")
</pallas_src>

<mosaic_0001>
module attributes {stable_mosaic.version = 11 : i64} {
  func.func @_prep_kernel(%arg0: i32, %arg1: memref<64x16xf32, #tpu.memory_space<vmem>>, %arg2: memref<16x128xf32, #tpu.memory_space<vmem>>, %arg3: memref<2x32xf32, #tpu.memory_space<vmem>>, %arg4: memref<16x64xf32, #tpu.memory_space<vmem>>, %arg5: memref<64x128xbf16, #tpu.memory_space<vmem>>, %arg6: memref<2x64xf32, #tpu.memory_space<vmem>>) attributes {dimension_semantics = [#tpu.dimension_semantics<parallel>], iteration_bounds = array<i64: 1>, scalar_prefetch = 0 : i64, scratch_operands = 0 : i64, tpu.core_type = #tpu.core_type<tc>, window_params = [{transform_indices = @transform_0, window_bounds = array<i64: 64, 16>}, {pipeline_mode = #tpu.pipeline_mode<synchronous>, transform_indices = @transform_1, window_bounds = array<i64: 16, 128>}, {pipeline_mode = #tpu.pipeline_mode<synchronous>, transform_indices = @transform_2, window_bounds = array<i64: 2, 32>}, {transform_indices = @transform_3, window_bounds = array<i64: 16, 64>}, {transform_indices = @transform_4, window_bounds = array<i64: 64, 128>}, {transform_indices = @transform_5, window_bounds = array<i64: 2, 64>}]} {
    %c0 = arith.constant 0 : index
    %c0_0 = arith.constant 0 : index
    %0 = vector.load %arg1[%c0, %c0_0] : memref<64x16xf32, #tpu.memory_space<vmem>>, vector<64x16xf32>
    %1 = arith.mulf %0, %0 : vector<64x16xf32>
    %cst = arith.constant dense<0.000000e+00> : vector<64xf32>
    %2 = vector.multi_reduction <add>, %1, %cst [1] : vector<64x16xf32> to vector<64xf32>
    %3 = vector.shape_cast %2 : vector<64xf32> to vector<64x1xf32>
    %cst_1 = arith.constant 0.000000e+00 : f32
    %4 = vector.broadcast %cst_1 : f32 to vector<64x1xf32>
    %5 = arith.cmpf ogt, %3, %4 : vector<64x1xf32>
    %6 = math.rsqrt %3 : vector<64x1xf32>
    %cst_2 = arith.constant 0.000000e+00 : f32
    %7 = vector.broadcast %cst_2 : f32 to vector<64x1xf32>
    %8 = arith.select %5, %6, %7 : vector<64x1xi1>, vector<64x1xf32>
    %9 = vector.broadcast %8 : vector<64x1xf32> to vector<64x16xf32>
    %10 = arith.mulf %0, %9 : vector<64x16xf32>
    %11 = tpu.transpose %10, [1, 0] : vector<64x16xf32> -> vector<16x64xf32>
    %c0_3 = arith.constant 0 : index
    %c0_4 = arith.constant 0 : index
    %12 = vector.load %arg4[%c0_3, %c0_4] : memref<16x64xf32, #tpu.memory_space<vmem>>, vector<16x64xf32>
    tpu.vector_store %arg4[%c0_3, %c0_4], %11 {strides = array<i32>} : memref<16x64xf32, #tpu.memory_space<vmem>>, vector<16x64xf32>,
    %13 = arith.truncf %0 : vector<64x16xf32> to vector<64x16xbf16>
    %c0_5 = arith.constant 0 : index
    %c0_6 = arith.constant 0 : index
    %14 = vector.load %arg2[%c0_5, %c0_6] : memref<16x128xf32, #tpu.memory_space<vmem>>, vector<16x128xf32>
    %15 = arith.truncf %14 : vector<16x128xf32> to vector<16x128xbf16>
    %cst_7 = arith.constant dense<0.000000e+00> : vector<64x128xf32>
    %16 = tpu.matmul %13, %15, %cst_7 {dimension_numbers = #tpu.dot_dimension_numbers<[1], [0], [0], [1], [0, 0, 1, 1], [], []>} : vector<64x16xbf16>, vector<16x128xbf16>, vector<64x128xf32> -> vector<64x128xf32>
    %17 = arith.truncf %16 : vector<64x128xf32> to vector<64x128xbf16>
    %c0_8 = arith.constant 0 : index
    %c0_9 = arith.constant 0 : index
    %18 = vector.load %arg5[%c0_8, %c0_9] : memref<64x128xbf16, #tpu.memory_space<vmem>>, vector<64x128xbf16>
    tpu.vector_store %arg5[%c0_8, %c0_9], %17 {strides = array<i32>} : memref<64x128xbf16, #tpu.memory_space<vmem>>, vector<64x128xbf16>,
    %c0_10 = arith.constant 0 : index
    %c0_11 = arith.constant 0 : index
    %19 = vector.load %arg3[%c0_10, %c0_11] : memref<2x32xf32, #tpu.memory_space<vmem>>, vector<2x32xf32>
    %20 = vector.extract_strided_slice %19 {offsets = [0, 0], sizes = [1, 32], strides = [1, 1]} : vector<2x32xf32> to vector<1x32xf32>
    %21 = vector.extract_strided_slice %16 {offsets = [0, 0], sizes = [64, 32], strides = [1, 1]} : vector<64x128xf32> to vector<64x32xf32>
    %cst_12 = arith.constant dense<0.000000e+00> : vector<1x64xf32>
    %22 = tpu.matmul %20, %21, %cst_12 {dimension_numbers = #tpu.dot_dimension_numbers<[1], [1], [0], [0], [0, 0, 1, 0], [], []>} : vector<1x32xf32>, vector<64x32xf32>, vector<1x64xf32> -> vector<1x64xf32>
    %c0_13 = arith.constant 0 : index
    %c0_14 = arith.constant 0 : index
    %23 = vector.load %arg6[%c0_13, %c0_14] : memref<2x64xf32, #tpu.memory_space<vmem>>, vector<1x64xf32>
    tpu.vector_store %arg6[%c0_13, %c0_14], %22 {strides = array<i32>} : memref<2x64xf32, #tpu.memory_space<vmem>>, vector<1x64xf32>,
    %24 = vector.extract_strided_slice %19 {offsets = [1, 0], sizes = [1, 32], strides = [1, 1]} : vector<2x32xf32> to vector<1x32xf32>
    %25 = vector.extract_strided_slice %16 {offsets = [0, 32], sizes = [64, 32], strides = [1, 1]} : vector<64x128xf32> to vector<64x32xf32>
    %cst_15 = arith.constant dense<0.000000e+00> : vector<1x64xf32>
    %26 = tpu.matmul %24, %25, %cst_15 {dimension_numbers = #tpu.dot_dimension_numbers<[1], [1], [0], [0], [0, 0, 1, 0], [], []>} : vector<1x32xf32>, vector<64x32xf32>, vector<1x64xf32> -> vector<1x64xf32>
    %c1 = arith.constant 1 : index
    %c0_16 = arith.constant 0 : index
    %27 = vector.load %arg6[%c1, %c0_16] : memref<2x64xf32, #tpu.memory_space<vmem>>, vector<1x64xf32>
    tpu.vector_store %arg6[%c1, %c0_16], %26 {strides = array<i32>} : memref<2x64xf32, #tpu.memory_space<vmem>>, vector<1x64xf32>,
    return
  }
  func.func @transform_0(%arg0: i32) -> (i32, i32) {
    %c0_i32 = arith.constant 0 : i32
    %c0_i32_0 = arith.constant 0 : i32
    return %arg0, %c0_i32 : i32, i32
  }
  func.func @transform_1(%arg0: i32) -> (i32, i32) {
    %c0_i32 = arith.constant 0 : i32
    %c0_i32_0 = arith.constant 0 : i32
    %c0_i32_1 = arith.constant 0 : i32
    return %c0_i32, %c0_i32_0 : i32, i32
  }
  func.func @transform_2(%arg0: i32) -> (i32, i32) {
    %c0_i32 = arith.constant 0 : i32
    %c0_i32_0 = arith.constant 0 : i32
    %c0_i32_1 = arith.constant 0 : i32
    return %c0_i32, %c0_i32_0 : i32, i32
  }
  func.func @transform_3(%arg0: i32) -> (i32, i32) {
    %c0_i32 = arith.constant 0 : i32
    %c0_i32_0 = arith.constant 0 : i32
    return %c0_i32, %arg0 : i32, i32
  }
  func.func @transform_4(%arg0: i32) -> (i32, i32) {
    %c0_i32 = arith.constant 0 : i32
    %c0_i32_0 = arith.constant 0 : i32
    return %arg0, %c0_i32 : i32, i32
  }
  func.func @transform_5(%arg0: i32) -> (i32, i32) {
    %c0_i32 = arith.constant 0 : i32
    %c0_i32_0 = arith.constant 0 : i32
    return %c0_i32, %arg0 : i32, i32
  }
}

</mosaic_0001>

<bundles_post_ra>
// kernel: tpu_custom_call.1
= control target key start
LH: loop header
LB: loop body
LE: loop exit
PB: predicated region body
PF: predicated region fallthrough
CT: control target
= control target key end

     0   :  { %11 = vsyncpa [#allocation3], 0  ;;  %vm36_vm0 = vcmask 130048   ;;  %s906_s0 = inlined_call_operand.vmem [shape: f32[64,16], index: 0, kind: input, shape index: {}]   ;;  %s907_s1 = inlined_call_operand.vmem [shape: f32[16,128], index: 1, kind: input, shape index: {}]   ;;  %s908_s2 = inlined_call_operand.vmem [shape: f32[2,32], index: 2, kind: input, shape index: {}]   ;;  %s909_s3 = inlined_call_operand.hbm [shape: f32[16,64], index: 3, kind: output, shape index: {0}]   ;;  %s910_s4 = inlined_call_operand.hbm [shape: bf16[64,128], index: 4, kind: output, shape index: {1}]   ;;  %s911_s5 = inlined_call_operand.hbm [shape: f32[2,64], index: 5, kind: output, shape index: {2}]  }
   0x1   :  { %v132_v0 = vld [vmem:[%s907_s1] sm:$0xff]  ;;  %v133_v1 = vld [vmem:[%s907_s1 + $0x8] sm:$0xff]  ;;  %v785_v5 = vld [vmem:[%s906_s0 + $0x10] sm:$0xff] }
   0x2   :  { %v775_v2 = vld [vmem:[%s906_s0] sm:$0xff]  ;;  %v134_v3 = vpack.c.bf16 %v133_v1, %v132_v0  ;;  %v780_v4 = vld [vmem:[%s906_s0 + $0x8] sm:$0xff]  ;;  %v790_v6 = vld [vmem:[%s906_s0 + $0x18] sm:$0xff] }
   0x3   :  { %v128_v7 = vpack.c.bf16 %v780_v4, %v775_v2  ;;  %v797_v8 = vld [vmem:[%s906_s0 + $0x20] sm:$0xff]  ;;  %v802_v9 = vld [vmem:[%s906_s0 + $0x28] sm:$0xff]  ;;  %v129_v10 = vpack.c.bf16 %v790_v6, %v785_v5 }
   0x4   :  { %588 = vmatprep.subr.bf16.mxu0 %v134_v3 }
   0x5   :  { %12 = vsyncpa [#allocation5], 0  ;;  %589 = vmatpush3.bf16.msra.mxu0 %v134_v3  ;;  %590 = vmatprep.mubr.msk.bf16.mxu0 %vm36_vm0, %v128_v7  ;;  %v130_v11 = vpack.c.bf16 %v802_v9, %v797_v8  ;;  %v814_v12 = vld [vmem:[%s906_s0 + $0x30] sm:$0xff]  ;;  %v819_v13 = vld [vmem:[%s906_s0 + $0x38] sm:$0xff]  ;;  %v726_v15 = vmov 0.0   ;;  %vm253_vm1 = vcmask 261120   ;;  %v28_v29 = vmul.f32 %v775_v2, %v775_v2 }
   0x6   :  { %v131_v14 = vpack.c.bf16 %v819_v13, %v814_v12  ;;  %598 = vmatprep.subr.mxu1 %v726_v15  ;;  %617 = vmatprep.subr.mxu0 %v726_v15  ;;  %s727_s0 = smov 96   ;;  %vm728_vm2 = vmmov 0   ;;  %v252_v28 = vld [vmem:[%s908_s2] sm:$0x3]  ;;  %v30_v31 = vmul.f32 %v785_v5, %v785_v5  ;;  %v29_v32 = vmul.f32 %v780_v4, %v780_v4  ;;  %s729_s2 = smov [#allocation4]  }
   0x7   :  { %614 = vmatprep.mubr.msk.f32.mxu1 %vm728_vm2, %v726_v15  ;;  %v37_v30 = vsel %vm36_vm0, %v28_v29, 0.0  ;;  %v31_v34 = vmul.f32 %v790_v6, %v790_v6  ;;  %v32_v36 = vmul.f32 %v797_v8, %v797_v8  ;;  %v33_v38 = vmul.f32 %v802_v9, %v802_v9  ;;  %s476_s14 = sshll.u32 %s729_s2, 4  ;;  %s477_s14 = int_to_ptr.vmem [resolvable:$true] %s476_s14 }
   0x8   :  { %591 = vmatmul.mubr.msk.bf16.vlgmr.msra.gmra.mxu0 %vm36_vm0, %v129_v10  ;;  %v43_v33 = vsel %vm36_vm0, %v30_v31, 0.0  ;;  %v40_v35 = vsel %vm36_vm0, %v29_v32, 0.0  ;;  %v34_v40 = vmul.f32 %v814_v12, %v814_v12  ;;  %v35_v42 = vmul.f32 %v819_v13, %v819_v13  ;;  %s662_s15 = scalar_lea.vmem %s477_s14, 512  ;;  %p667_p1 = scmp.lt.s32.totalorder %s477_s14, %s477_s14 }
   0x9   :  { %594 = vmatprep.mubr.msk.bf16.mxu0 %vm36_vm0, %v130_v11  ;;  %v46_v37 = vsel %vm36_vm0, %v31_v34, 0.0  ;;  %v49_v39 = vsel %vm36_vm0, %v32_v36, 0.0  ;;  %v52_v41 = vsel %vm36_vm0, %v33_v38, 0.0  ;;  %v353_v53 = vrot.slane %v252_v28, 1  ;;  %p663_p0 = scmp.ne.s32.totalorder %s477_s14, %s662_s15  ;;  %p668_p2 = scmp.lt.s32.totalorder %s662_s15, %s662_s15 }
   0xa   :  { %v55_v43 = vsel %vm36_vm0, %v34_v40, 0.0  ;;  %v58_v44 = vsel %vm36_vm0, %v35_v42, 0.0 }
   0xb   :  { %p669_p3 = por %p668_p2, %p667_p1 }
   0xd   :  { %p670_p4 = pnand %p669_p3, %p663_p0 }
  0x10   :  { %595 = vmatmul.mubr.msk.bf16.gmra.mxu0 %vm36_vm0, %v131_v14 }
  0x11   :  { %633 = vmatprep.mubr.msk.f32.mxu0 %vm728_vm2, %v726_v15 }
  0xc8   :  { %v592_v16 = vpop.f32.mrf.mxu0 }
  0xca   :  { %v181_v17 = vpop.f32.mrf.mxu0 }
  0xcc   :  { %v593_v18 = vpop.f32.mrf.mxu0 }
  0xcd   :  { %v550_v19 = vpack.c.bf16 %v593_v18, %v592_v16 }
  0xce   :  { %v184_v20 = vpop.f32.mrf.mxu0 }
  0xcf   :  { %562 = vst [vmem:[#allocation4 + $0x8] sm:$0xff] %v550_v19   ;;  %v545_v21 = vpack.c.bf16 %v184_v20, %v181_v17 }
  0xd0   :  { %v596_v22 = vpop.f32.mrf.mxu0 }
  0xd1   :  { %546 = vst [vmem:[#allocation4] sm:$0xff] %v545_v21  }
  0xd2   :  { %v197_v23 = vpop.f32.mrf.mxu0 }
  0xd4   :  { %v597_v24 = vpop.f32.mrf.mxu0 }
  0xd5   :  { %v560_v25 = vpack.c.bf16 %v597_v24, %v596_v22  ;;  %368 = vrot.lane.b32.xlu0 %v597_v24, %s727_s0  ;;  %599 = vmatpush3.xpose.msk.msra.mxu1 %vm253_vm1, %v597_v24 }
  0xd6   :  { %v200_v26 = vpop.f32.mrf.mxu0  ;;  %600 = vmatprep.subr.mxu1 %v726_v15 }
  0xd7   :  { %564 = vst [vmem:[#allocation4 + $0x18] sm:$0xff] %v560_v25   ;;  %v555_v27 = vpack.c.bf16 %v200_v26, %v197_v23  ;;  %364 = vrot.lane.b32.xlu1 %v200_v26, %s727_s0 }
  0xd9   :  { %563 = vst [vmem:[#allocation4 + $0x10] sm:$0xff] %v555_v27   ;;  %366 = vrot.lane.b32.xlu0 %v596_v22, %s727_s0  ;;  %601 = vmatpush3.xpose.msk.msra.mxu1 %vm253_vm1, %v596_v22 }
  0xda   :  { %602 = vmatprep.subr.mxu1 %v726_v15 }
  0xdb   :  { %362 = vrot.lane.b32.xlu1 %v197_v23, %s727_s0 }
  0xdd   :  { %360 = vrot.lane.b32.xlu0 %v593_v18, %s727_s0  ;;  %603 = vmatpush3.xpose.msk.msra.mxu1 %vm253_vm1, %v200_v26 }
  0xde   :  { %604 = vmatprep.subr.mxu1 %v726_v15 }
  0xdf   :  { %358 = vrot.lane.b32.xlu1 %v592_v16, %s727_s0 }
  0xe1   :  { %356 = vrot.lane.b32.xlu0 %v184_v20, %s727_s0  ;;  %605 = vmatpush3.xpose.msk.msra.mxu1 %vm253_vm1, %v197_v23 }
  0xe2   :  { %606 = vmatprep.subr.mxu1 %v726_v15 }
  0xe3   :  { %354 = vrot.lane.b32.xlu1 %v181_v17, %s727_s0 }
  0xe5   :  { %607 = vmatpush3.xpose.msk.msra.mxu1 %vm253_vm1, %v593_v18 }
  0xe6   :  { %608 = vmatprep.subr.mxu1 %v726_v15 }
  0xe9   :  { %609 = vmatpush3.xpose.msk.msra.mxu1 %vm253_vm1, %v592_v16 }
  0xea   :  { %610 = vmatprep.subr.mxu1 %v726_v15 }
  0xed   :  { %611 = vmatpush3.xpose.msk.msra.mxu1 %vm253_vm1, %v184_v20 }
  0xee   :  { %612 = vmatprep.subr.mxu1 %v726_v15 }
  0xf1   :  { %613 = vmatpush3.xpose.msk.msra.mxu1 %vm253_vm1, %v181_v17 }
  0xf4   :  { %615 = vmatmul.mubr.msk.f32.vlgmr.msra.gmra.mxu1 %vm253_vm1, %v252_v28 }
 0x100   :  { %38 = vadd.xlane.f32.xlu0 %v37_v30 }
 0x104   :  { %44 = vadd.xlane.f32.xlu0 %v43_v33 }
 0x107   :  { %41 = vadd.xlane.f32.xlu1 %v40_v35 }
 0x108   :  { %47 = vadd.xlane.f32.xlu0 %v46_v37 }
 0x10b   :  { %50 = vadd.xlane.f32.xlu1 %v49_v39 }
 0x10c   :  { %53 = vadd.xlane.f32.xlu0 %v52_v41 }
 0x10f   :  { %56 = vadd.xlane.f32.xlu1 %v55_v43 }
 0x110   :  { %59 = vadd.xlane.f32.xlu0 %v58_v44 }
 0x147   :  { %v369_v45 = vpop.permute.xlu0 %368 }
 0x148   :  { %618 = vmatpush3.xpose.msk.msra.mxu0 %vm253_vm1, %v369_v45 }
 0x149   :  { %619 = vmatprep.subr.mxu0 %v726_v15  ;;  %v365_v47 = vpop.permute.xlu1 %364 }
 0x14b   :  { %v367_v46 = vpop.permute.xlu0 %366 }
 0x14c   :  { %620 = vmatpush3.xpose.msk.msra.mxu0 %vm253_vm1, %v367_v46 }
 0x14d   :  { %621 = vmatprep.subr.mxu0 %v726_v15  ;;  %v363_v48 = vpop.permute.xlu1 %362 }
 0x14f   :  { %v361_v49 = vpop.permute.xlu0 %360 }
 0x150   :  { %622 = vmatpush3.xpose.msk.msra.mxu0 %vm253_vm1, %v365_v47 }
 0x151   :  { %623 = vmatprep.subr.mxu0 %v726_v15  ;;  %v359_v50 = vpop.permute.xlu1 %358 }
 0x153   :  { %v357_v51 = vpop.permute.xlu0 %356 }
 0x154   :  { %624 = vmatpush3.xpose.msk.msra.mxu0 %vm253_vm1, %v363_v48 }
 0x155   :  { %625 = vmatprep.subr.mxu0 %v726_v15  ;;  %v355_v52 = vpop.permute.xlu1 %354 }
 0x158   :  { %626 = vmatpush3.xpose.msk.msra.mxu0 %vm253_vm1, %v361_v49 }
 0x159   :  { %627 = vmatprep.subr.mxu0 %v726_v15 }
 0x15c   :  { %628 = vmatpush3.xpose.msk.msra.mxu0 %vm253_vm1, %v359_v50 }
 0x15d   :  { %629 = vmatprep.subr.mxu0 %v726_v15 }
 0x160   :  { %630 = vmatpush3.xpose.msk.msra.mxu0 %vm253_vm1, %v357_v51 }
 0x161   :  { %631 = vmatprep.subr.mxu0 %v726_v15 }
 0x164   :  { %632 = vmatpush3.xpose.msk.msra.mxu0 %vm253_vm1, %v355_v52 }
 0x167   :  { %634 = vmatmul.mubr.msk.f32.vlgmr.msra.gmra.mxu0 %vm253_vm1, %v353_v53 }
 0x189   :  { %v39_v54 = vpop.xlane.xlu0 %38 }
 0x18a   :  { %646 = vrsqrt.f32 %v39_v54  ;;  %vm61_vm3 = vcmp.gt.f32.partialorder %v39_v54, 0.0 }
 0x18d   :  { %v45_v55 = vpop.xlane.xlu0 %44 }
 0x18e   :  { %648 = vrsqrt.f32 %v45_v55  ;;  %vm63_vm5 = vcmp.gt.f32.partialorder %v45_v55, 0.0 }
 0x190   :  { %v42_v56 = vpop.xlane.xlu1 %41 }
 0x191   :  { %650 = vrsqrt.f32 %v42_v56  ;;  %v48_v57 = vpop.xlane.xlu0 %47  ;;  %vm62_vm4 = vcmp.gt.f32.partialorder %v42_v56, 0.0 }
 0x192   :  { %652 = vrsqrt.f32 %v48_v57  ;;  %vm64_vm6 = vcmp.gt.f32.partialorder %v48_v57, 0.0 }
 0x194   :  { %v51_v58 = vpop.xlane.xlu1 %50 }
 0x195   :  { %654 = vrsqrt.f32 %v51_v58  ;;  %v54_v62 = vpop.xlane.xlu0 %53  ;;  %vm65_vm7 = vcmp.gt.f32.partialorder %v51_v58, 0.0 }
 0x196   :  { %656 = vrsqrt.f32 %v54_v62 }
 0x197   :  { %v647_v59 = vpop.eup %646 }
 0x198   :  { %v77_v60 = vsel %vm61_vm3, %v647_v59, 0.0  ;;  %v57_v1 = vpop.xlane.xlu1 %56 }
 0x199   :  { %v85_v61 = vmul.f32 %v77_v60, %v775_v2  ;;  %658 = vrsqrt.f32 %v57_v1  ;;  %v60_v14 = vpop.xlane.xlu0 %59 }
 0x19a   :  { %660 = vrsqrt.f32 %v60_v14 }
 0x19b   :  { %93 = vxpose.xlu1.b32.start [1/8] (short) (narrow) %v85_v61, 16  ;;  %v649_v63 = vpop.eup %648 }
 0x19c   :  { %v79_v10 = vsel %vm63_vm5, %v649_v63, 0.0 }
 0x19d   :  { %v87_v15 = vmul.f32 %v79_v10, %v785_v5 }
 0x19e   :  { %v651_v0 = vpop.eup %650 }
 0x19f   :  { %v78_v3 = vsel %vm62_vm4, %v651_v0, 0.0  ;;  %v653_v11 = vpop.eup %652 }
 0x1a0   :  { %v86_v7 = vmul.f32 %v78_v3, %v780_v4  ;;  %v80_v2 = vsel %vm64_vm6, %v653_v11, 0.0 }
 0x1a1   :  { %v88_v17 = vmul.f32 %v80_v2, %v790_v6 }
 0x1a2   :  { %94 = vxpose.xlu1.b32.cont [2/8] (short) (narrow) %v86_v7, 16  ;;  %v655_v16 = vpop.eup %654 }
 0x1a3   :  { %v81_v18 = vsel %vm65_vm7, %v655_v16, 0.0 }
 0x1a6   :  { %95 = vxpose.xlu1.b32.cont [3/8] (short) (narrow) %v87_v15, 16 }
 0x1a7   :  { %673 = shalt.err (!%p670_p4)
}
 0x1a8   :  { %s730_s16 = smov 64   ;;  %s731_s17 = smov 4   ;;  %v657_v4 = vpop.eup %656  ;;  %vm66_vm8 = vcmp.gt.f32.partialorder %v54_v62, 0.0  ;;  %v89_v5 = vmul.f32 %v81_v18, %v797_v8  ;;  %vm67_vm9 = vcmp.gt.f32.partialorder %v57_v1, 0.0  ;;  %vm68_vm10 = vcmp.gt.f32.partialorder %v60_v14, 0.0 }
 0x1a9   :  { %482 = dma.vmem_to_hbm [thread:$0]  %s477_s14, 512, %s910_s4, [#allocation5], %s730_s16, %s730_s16, %s731_s17   ;;  %v82_v6 = vsel %vm66_vm8, %v657_v4, 0.0  ;;  %v659_v19 = vpop.eup %658  ;;  %vm351_vm11 = vcmask 516096   ;;  %vm125_vm12 = vcmask 523264  }
 0x1aa   :  { %96 = vxpose.xlu1.b32.cont [4/8] (short) (narrow) %v88_v17, 16  ;;  %v90_v20 = vmul.f32 %v82_v6, %v802_v9  ;;  %v83_v21 = vsel %vm67_vm9, %v659_v19, 0.0  ;;  %v661_v22 = vpop.eup %660  ;;  %s732_s4 = smov [#allocation2]  }
 0x1ab   :  { %v91_v23 = vmul.f32 %v83_v21, %v814_v12  ;;  %v84_v25 = vsel %vm68_vm10, %v661_v22, 0.0  ;;  %s464_s20 = sshll.u32 %s732_s4, 4  ;;  %s465_s20 = int_to_ptr.vmem [resolvable:$true] %s464_s20 }
 0x1ac   :  { %v92_v8 = vmul.f32 %v84_v25, %v819_v13  ;;  %s682_s21 = scalar_lea.vmem %s465_s20, 256  ;;  %p687_p6 = scmp.lt.s32.totalorder %s465_s20, %s465_s20 }
 0x1ad   :  { %p683_p5 = scmp.ne.s32.totalorder %s465_s20, %s682_s21  ;;  %p688_p7 = scmp.lt.s32.totalorder %s682_s21, %s682_s21 }
 0x1ae   :  { %97 = vxpose.xlu1.b32.cont [5/8] (short) (narrow) %v89_v5, 16 }
 0x1af   :  { %p689_p8 = por %p688_p7, %p687_p6 }
 0x1b1   :  { %p690_p9 = pnand %p689_p8, %p683_p5 }
 0x1b2   :  { %98 = vxpose.xlu1.b32.cont [6/8] (short) (narrow) %v90_v20, 16 }
 0x1b4   :  { %v347_v24 = vpop.f32.mrf.mxu1 }
 0x1b5   :  { %352 = vst.msk [vmem:[#allocation6] sm:$0x1] %vm351_vm11, %v347_v24 }
 0x1b6   :  { %99 = vxpose.xlu1.b32.cont [7/8] (short) (narrow) %v91_v23, 16  ;;  %v616_v26 = vpop.f32.mrf.mxu1 }
 0x1ba   :  { %100 = vxpose.xlu1.b32.end [8/8] (short) (narrow) %v92_v8, 16 }
 0x21a   :  { %v109_v9 = vpop.trf.xlu1 }
 0x21b   :  { %126 = vst.msk [vmem:[#allocation2] sm:$0xff] %vm125_vm12, %v109_v9 }
 0x21e   :  { %v110_v27 = vpop.trf.xlu1 }
 0x21f   :  { %127 = vst.msk [vmem:[#allocation2 + $0x8] sm:$0xff] %vm125_vm12, %v110_v27 }
 0x220   :  { %693 = shalt.err (!%p690_p9)
}
 0x221   :  { %s733_s22 = smov 128   ;;  %s734_s23 = smov 8  }
 0x222   :  { %470 = dma.vmem_to_hbm [thread:$0]  %s465_s20, 256, %s909_s3, [#allocation3], %s733_s22, %s733_s22, %s734_s23  }
 0x223   :  { %s735_s26 = smov [#allocation6]  }
 0x224   :  { %s489_s27 = sshll.u32 %s735_s26, 4  ;;  %s490_s27 = int_to_ptr.vmem [resolvable:$true] %s489_s27 }
 0x225   :  { %s702_s28 = scalar_lea.vmem %s490_s27, 32  ;;  %p707_p11 = scmp.lt.s32.totalorder %s490_s27, %s490_s27 }
 0x226   :  { %p703_p10 = scmp.ne.s32.totalorder %s490_s27, %s702_s28  ;;  %p708_p12 = scmp.lt.s32.totalorder %s702_s28, %s702_s28 }
 0x227   :  { %v454_v12 = vpop.f32.mrf.mxu0 }
 0x228   :  { %458 = vst.msk [vmem:[#allocation6 + $0x1] sm:$0x1] %vm351_vm11, %v454_v12  ;;  %p709_p13 = por %p708_p12, %p707_p11 }
 0x229   :  { %v635_v13 = vpop.f32.mrf.mxu0 }
 0x22a   :  { %p710_p0 = pnand %p709_p13, %p703_p10 }
 0x22c   :  { %713 = shalt.err (!%p710_p0)
}
 0x22d   :  { %492 = dma.vmem_to_hbm [thread:$0]  %s490_s27, 32, %s911_s5, [#allocation5]  }
 0x22e   :  { %722 = dma.done.wait [#allocation3], 256  }
 0x22f   :  { %723 = vsyncadd [#allocation3], 4294967040 }
 0x230   :  { %724 = dma.done.wait [#allocation5], 544  }
 0x231   :  { %725 = vsyncadd [#allocation5], 4294966752 }
 0x232   :  { %502 = vsyncpa [#allocation3], 1 }
 0x233   :  { %503 = vsyncpa [#allocation5], 1 }

</bundles_post_ra>
